<compile_context>
chip_gen: v6e
topology: v6e:2x2x1
jax: 0.10.0
libtpu: 0.0.40
codegen_flags: <defaults>
</compile_context>

<pallas_src>
import functools

import jax
import jax.numpy as jnp
from jax.experimental import pallas as pl
from jax.experimental.pallas import tpu as pltpu

LANE = 128


def _round_up(x, m):
    return (x + m - 1) // m * m


def _pad2(a, rows, cols):
    r, c = a.shape
    return jnp.pad(a, ((0, rows - r), (0, cols - c)))


def _mm(x, w_ref, b_ref):
    """bf16-operand MXU matmul with f32 accumulate + f32 bias."""
    return jnp.dot(x.astype(jnp.bfloat16), w_ref[...],
                   preferred_element_type=jnp.float32) + b_ref[...]


def aae_cluster_kernel(
    x_ref, noise_ref,
    w1_ref, b1_ref, w2_ref, b2_ref, wz_ref, bz_ref,        # encoder
    wfz_ref, bfz_ref,                                      # fused z-consumers
    wd2_ref, bd2_ref, wd3_ref, bd3_ref,                    # decoder tail
    wf2_ref, bf2_ref,                                      # discriminator tail
    xbar_ref, qdz_ref,                                     # outputs
    *, alpha: float, n_clusters: int, p_d2: int, p_f1: int,
):
    # ---- encoder (input noise folded in) ----
    x = x_ref[...] + noise_ref[...] * 0.1
    h1 = jnp.maximum(_mm(x, w1_ref, b1_ref), 0.0)
    h2 = jnp.maximum(_mm(h1, w2_ref, b2_ref), 0.0)
    z = _mm(h2, wz_ref, bz_ref)                             # (tm, P_Z), f32

    # ---- single fused matmul for all three consumers of z ----
    # columns: [ decoder-L4 pre-act | discr-F1 pre-act | ||c_j||^2 - 2 z.c_j ]
    fused = _mm(z, wfz_ref, bfz_ref)
    d1 = jnp.maximum(fused[:, :p_d2], 0.0)
    f1 = jnp.maximum(fused[:, p_d2:p_d2 + p_f1], 0.0)
    cross = fused[:, p_d2 + p_f1:]                          # (tm, P_Q)

    # ---- decoder tail ----
    d2 = jnp.maximum(_mm(d1, wd2_ref, bd2_ref), 0.0)
    xbar_ref[...] = _mm(d2, wd3_ref, bd3_ref)               # lane-dense store

    # ---- discriminator tail (real column pre-placed at lane n_clusters) ----
    f2 = jnp.maximum(_mm(f1, wf2_ref, bf2_ref), 0.0)
    dz = jax.nn.sigmoid(f2)

    # ---- Student-t cluster assignment ----
    z_sq = jnp.sum(z * z, axis=1, keepdims=True)            # (tm, 1)
    dist2 = jnp.maximum(z_sq + cross, 0.0)
    q = 1.0 / (1.0 + dist2 / alpha)
    exponent = (alpha + 1.0) / 2.0
    if exponent != 1.0:
        q = q ** exponent
    col = jax.lax.broadcasted_iota(jnp.int32, q.shape, 1)
    q = jnp.where(col < n_clusters, q, 0.0)                 # drop padded clusters
    q = q * pl.reciprocal(jnp.sum(q, axis=1, keepdims=True), approx=True)

    # packed lane-dense output: [ q (K lanes) | d_z (lane K) | zeros ]
    qdz_ref[...] = jnp.where(col == n_clusters, dz, q)


def aae_cluster_forward(x, noise, params, *, alpha=1.0, tile_m=128):
    B, n_input = x.shape
    n_clusters, n_z = params["cluster"].shape
    n_enc_1 = params["w1"].shape[1]
    n_enc_2 = params["w2"].shape[1]
    n_dec_2 = params["wd1"].shape[1]
    n_dec_3 = params["wd2"].shape[1]
    n_f1 = params["wf1"].shape[1]

    p_in = _round_up(n_input, LANE)
    p_e1 = _round_up(n_enc_1, LANE)
    p_e2 = _round_up(n_enc_2, LANE)
    p_z = _round_up(n_z, LANE)
    p_d2 = _round_up(n_dec_2, LANE)
    p_d3 = _round_up(n_dec_3, LANE)
    p_f1 = _round_up(n_f1, LANE)
    p_q = _round_up(n_clusters + 1, LANE)      # packed [q | d_z] output width

    # --- pad + pack parameters once (weights bf16, biases f32) ---
    bf16 = jnp.bfloat16
    w1 = _pad2(params["w1"], p_in, p_e1).astype(bf16)
    b1 = _pad2(params["b1"], 1, p_e1)
    w2 = _pad2(params["w2"], p_e1, p_e2).astype(bf16)
    b2 = _pad2(params["b2"], 1, p_e2)
    wz = _pad2(params["wz"], p_e2, p_z).astype(bf16)
    bz = _pad2(params["bz"], 1, p_z)

    # fused z-consumers: [wd1 | wf1 | -2*cluster^T], bias [bd1 | bf1 | ||c||^2]
    c = params["cluster"].astype(jnp.float32)
    ct = jnp.zeros((p_z, p_q), jnp.float32).at[:n_z, :n_clusters].set(-2.0 * c.T)
    wfz = jnp.concatenate(
        [_pad2(params["wd1"], p_z, p_d2), _pad2(params["wf1"], p_z, p_f1), ct],
        axis=1).astype(bf16)
    c_sq = jnp.sum(c * c, axis=1)
    bfz = jnp.concatenate(
        [_pad2(params["bd1"], 1, p_d2), _pad2(params["bf1"], 1, p_f1),
         jnp.zeros((1, p_q), jnp.float32).at[0, :n_clusters].set(c_sq)],
        axis=1)

    wd2 = _pad2(params["wd2"], p_d2, p_d3).astype(bf16)
    bd2 = _pad2(params["bd2"], 1, p_d3)
    wd3 = _pad2(params["wd3"], p_d3, p_in).astype(bf16)
    bd3 = _pad2(params["bd3"], 1, p_in)

    # discriminator output column placed at lane `n_clusters` of packed slab
    wf2 = jnp.zeros((p_f1, p_q), jnp.float32)
    wf2 = wf2.at[:n_f1, n_clusters].set(params["wf2"][:, 0]).astype(bf16)
    bf2 = jnp.zeros((1, p_q), jnp.float32).at[0, n_clusters].set(
        params["bf2"][0, 0])

    # --- batch tiling ---
    tm = min(tile_m, _round_up(B, 8))
    b_pad = _round_up(B, tm)
    x_p = _pad2(x.astype(jnp.float32), b_pad, p_in)
    n_p = _pad2(noise.astype(jnp.float32), b_pad, p_in)

    weights = (w1, b1, w2, b2, wz, bz, wfz, bfz, wd2, bd2, wd3, bd3, wf2, bf2)

    def row_spec(width):
        return pl.BlockSpec((tm, width), lambda i: (i, 0))

    def resident_spec(a):          # constant index map -> stays in VMEM
        return pl.BlockSpec(a.shape, lambda i: (0, 0))

    out_xbar, out_qdz = pl.pallas_call(
        functools.partial(aae_cluster_kernel, alpha=float(alpha),
                          n_clusters=n_clusters, p_d2=p_d2, p_f1=p_f1),
        out_shape=(jax.ShapeDtypeStruct((b_pad, p_in), jnp.float32),
                   jax.ShapeDtypeStruct((b_pad, p_q), jnp.float32)),
        grid=(b_pad // tm,),
        in_specs=[row_spec(p_in), row_spec(p_in)]
                 + [resident_spec(w) for w in weights],
        out_specs=(row_spec(p_in), row_spec(p_q)),
        compiler_params=pltpu.CompilerParams(
            dimension_semantics=("parallel",),
            vmem_limit_bytes=32 * 1024 * 1024),
    )(x_p, n_p, *weights)

    x_bar = out_xbar[:B, :n_input]
    q = out_qdz[:B, :n_clusters]
    d_z = out_qdz[:B, n_clusters:n_clusters + 1]
    return x_bar, q, d_z


def init_params(key, n_enc_1, n_enc_2, n_dec_2, n_dec_3, n_input, n_z, n_clusters):
    """Deterministic synthetic init. Weights stored as (in, out)."""
    def lin(k, fan_in, fan_out):
        kw, kb = jax.random.split(k)
        scale = 1.0 / jnp.sqrt(fan_in)
        w = jax.random.uniform(kw, (fan_in, fan_out), jnp.float32, -scale, scale)
        b = jax.random.uniform(kb, (1, fan_out), jnp.float32, -scale, scale)
        return w, b

    keys = jax.random.split(key, 10)
    p = {}
    p["w1"], p["b1"] = lin(keys[0], n_input, n_enc_1)
    p["w2"], p["b2"] = lin(keys[1], n_enc_1, n_enc_2)
    p["wz"], p["bz"] = lin(keys[2], n_enc_2, n_z)
    p["wd1"], p["bd1"] = lin(keys[3], n_z, n_dec_2)
    p["wd2"], p["bd2"] = lin(keys[4], n_dec_2, n_dec_3)
    p["wd3"], p["bd3"] = lin(keys[5], n_dec_3, n_input)
    p["wf1"], p["bf1"] = lin(keys[6], n_z, 128)
    p["wf2"], p["bf2"] = lin(keys[7], 128, 1)
    # xavier_normal_ for cluster_layer
    std = jnp.sqrt(2.0 / (n_clusters + n_z))
    p["cluster"] = std * jax.random.normal(keys[8], (n_clusters, n_z), jnp.float32)
    return p


if __name__ == "__main__":
    # Small config consistent with the module's constructor
    n_enc_1, n_enc_2 = 32, 32
    n_dec_2, n_dec_3 = 32, 32
    n_input, n_z, n_clusters = 64, 16, 8
    batch = 8
    alpha = 1.0

    key = jax.random.PRNGKey(0)
    k_x, k_noise, k_p = jax.random.split(key, 3)

    x = jax.random.normal(k_x, (batch, n_input), jnp.float32)
    # AE adds torch.randn(x.size()) * 0.1; the noise is generated here
    # deterministically and passed in as an input.
    noise = jax.random.normal(k_noise, (batch, n_input), jnp.float32)
    params = init_params(k_p, n_enc_1, n_enc_2, n_dec_2, n_dec_3,
                         n_input, n_z, n_clusters)

    x_bar, q, d_z = aae_cluster_forward(x, noise, params, alpha=alpha)
    jax.block_until_ready((x_bar, q, d_z))

    assert x_bar.shape == (batch, n_input)
    assert q.shape == (batch, n_clusters)
    assert d_z.shape == (batch, 1)
    # q rows must be (approximately) normalized probability rows
    assert bool(jnp.all(jnp.abs(jnp.sum(q, axis=1) - 1.0) < 1e-2))
    print("KERNEL_OK")
</pallas_src>

<mosaic_0001>
module attributes {stable_mosaic.version = 11 : i64} {
  func.func @aae_cluster_kernel(%arg0: i32, %arg1: memref<8x128xf32, #tpu.memory_space<vmem>>, %arg2: memref<8x128xf32, #tpu.memory_space<vmem>>, %arg3: memref<128x128xbf16, #tpu.memory_space<vmem>>, %arg4: memref<1x128xf32, #tpu.memory_space<vmem>>, %arg5: memref<128x128xbf16, #tpu.memory_space<vmem>>, %arg6: memref<1x128xf32, #tpu.memory_space<vmem>>, %arg7: memref<128x128xbf16, #tpu.memory_space<vmem>>, %arg8: memref<1x128xf32, #tpu.memory_space<vmem>>, %arg9: memref<128x384xbf16, #tpu.memory_space<vmem>>, %arg10: memref<1x384xf32, #tpu.memory_space<vmem>>, %arg11: memref<128x128xbf16, #tpu.memory_space<vmem>>, %arg12: memref<1x128xf32, #tpu.memory_space<vmem>>, %arg13: memref<128x128xbf16, #tpu.memory_space<vmem>>, %arg14: memref<1x128xf32, #tpu.memory_space<vmem>>, %arg15: memref<128x128xbf16, #tpu.memory_space<vmem>>, %arg16: memref<1x128xf32, #tpu.memory_space<vmem>>, %arg17: memref<8x128xf32, #tpu.memory_space<vmem>>, %arg18: memref<8x128xf32, #tpu.memory_space<vmem>>) attributes {dimension_semantics = [#tpu.dimension_semantics<parallel>], iteration_bounds = array<i64: 1>, scalar_prefetch = 0 : i64, scratch_operands = 0 : i64, tpu.core_type = #tpu.core_type<tc>, window_params = [{transform_indices = @transform_0, window_bounds = array<i64: 8, 128>}, {transform_indices = @transform_1, window_bounds = array<i64: 8, 128>}, {pipeline_mode = #tpu.pipeline_mode<synchronous>, transform_indices = @transform_2, window_bounds = array<i64: 128, 128>}, {pipeline_mode = #tpu.pipeline_mode<synchronous>, transform_indices = @transform_3, window_bounds = array<i64: 1, 128>}, {pipeline_mode = #tpu.pipeline_mode<synchronous>, transform_indices = @transform_4, window_bounds = array<i64: 128, 128>}, {pipeline_mode = #tpu.pipeline_mode<synchronous>, transform_indices = @transform_5, window_bounds = array<i64: 1, 128>}, {pipeline_mode = #tpu.pipeline_mode<synchronous>, transform_indices = @transform_6, window_bounds = array<i64: 128, 128>}, {pipeline_mode = #tpu.pipeline_mode<synchronous>, transform_indices = @transform_7, window_bounds = array<i64: 1, 128>}, {pipeline_mode = #tpu.pipeline_mode<synchronous>, transform_indices = @transform_8, window_bounds = array<i64: 128, 384>}, {pipeline_mode = #tpu.pipeline_mode<synchronous>, transform_indices = @transform_9, window_bounds = array<i64: 1, 384>}, {pipeline_mode = #tpu.pipeline_mode<synchronous>, transform_indices = @transform_10, window_bounds = array<i64: 128, 128>}, {pipeline_mode = #tpu.pipeline_mode<synchronous>, transform_indices = @transform_11, window_bounds = array<i64: 1, 128>}, {pipeline_mode = #tpu.pipeline_mode<synchronous>, transform_indices = @transform_12, window_bounds = array<i64: 128, 128>}, {pipeline_mode = #tpu.pipeline_mode<synchronous>, transform_indices = @transform_13, window_bounds = array<i64: 1, 128>}, {pipeline_mode = #tpu.pipeline_mode<synchronous>, transform_indices = @transform_14, window_bounds = array<i64: 128, 128>}, {pipeline_mode = #tpu.pipeline_mode<synchronous>, transform_indices = @transform_15, window_bounds = array<i64: 1, 128>}, {transform_indices = @transform_16, window_bounds = array<i64: 8, 128>}, {transform_indices = @transform_17, window_bounds = array<i64: 8, 128>}]} {
    %c0 = arith.constant 0 : index
    %c0_0 = arith.constant 0 : index
    %0 = vector.load %arg1[%c0, %c0_0] : memref<8x128xf32, #tpu.memory_space<vmem>>, vector<8x128xf32>
    %c0_1 = arith.constant 0 : index
    %c0_2 = arith.constant 0 : index
    %1 = vector.load %arg2[%c0_1, %c0_2] : memref<8x128xf32, #tpu.memory_space<vmem>>, vector<8x128xf32>
    %cst = arith.constant 1.000000e-01 : f32
    %2 = vector.broadcast %cst : f32 to vector<8x128xf32>
    %3 = arith.mulf %1, %2 : vector<8x128xf32>
    %4 = arith.addf %0, %3 : vector<8x128xf32>
    %5 = arith.truncf %4 : vector<8x128xf32> to vector<8x128xbf16>
    %c0_3 = arith.constant 0 : index
    %c0_4 = arith.constant 0 : index
    %6 = vector.load %arg3[%c0_3, %c0_4] : memref<128x128xbf16, #tpu.memory_space<vmem>>, vector<128x128xbf16>
    %cst_5 = arith.constant dense<0.000000e+00> : vector<8x128xf32>
    %7 = tpu.matmul %5, %6, %cst_5 {dimension_numbers = #tpu.dot_dimension_numbers<[1], [0], [0], [1], [0, 0, 1, 1], [], []>} : vector<8x128xbf16>, vector<128x128xbf16>, vector<8x128xf32> -> vector<8x128xf32>
    %c0_6 = arith.constant 0 : index
    %c0_7 = arith.constant 0 : index
    %8 = vector.load %arg4[%c0_6, %c0_7] : memref<1x128xf32, #tpu.memory_space<vmem>>, vector<1x128xf32>
    %9 = vector.broadcast %8 : vector<1x128xf32> to vector<8x128xf32>
    %10 = arith.addf %7, %9 : vector<8x128xf32>
    %cst_8 = arith.constant 0.000000e+00 : f32
    %11 = vector.broadcast %cst_8 : f32 to vector<8x128xf32>
    %12 = arith.maximumf %10, %11 : vector<8x128xf32>
    %13 = arith.truncf %12 : vector<8x128xf32> to vector<8x128xbf16>
    %c0_9 = arith.constant 0 : index
    %c0_10 = arith.constant 0 : index
    %14 = vector.load %arg5[%c0_9, %c0_10] : memref<128x128xbf16, #tpu.memory_space<vmem>>, vector<128x128xbf16>
    %cst_11 = arith.constant dense<0.000000e+00> : vector<8x128xf32>
    %15 = tpu.matmul %13, %14, %cst_11 {dimension_numbers = #tpu.dot_dimension_numbers<[1], [0], [0], [1], [0, 0, 1, 1], [], []>} : vector<8x128xbf16>, vector<128x128xbf16>, vector<8x128xf32> -> vector<8x128xf32>
    %c0_12 = arith.constant 0 : index
    %c0_13 = arith.constant 0 : index
    %16 = vector.load %arg6[%c0_12, %c0_13] : memref<1x128xf32, #tpu.memory_space<vmem>>, vector<1x128xf32>
    %17 = vector.broadcast %16 : vector<1x128xf32> to vector<8x128xf32>
    %18 = arith.addf %15, %17 : vector<8x128xf32>
    %cst_14 = arith.constant 0.000000e+00 : f32
    %19 = vector.broadcast %cst_14 : f32 to vector<8x128xf32>
    %20 = arith.maximumf %18, %19 : vector<8x128xf32>
    %21 = arith.truncf %20 : vector<8x128xf32> to vector<8x128xbf16>
    %c0_15 = arith.constant 0 : index
    %c0_16 = arith.constant 0 : index
    %22 = vector.load %arg7[%c0_15, %c0_16] : memref<128x128xbf16, #tpu.memory_space<vmem>>, vector<128x128xbf16>
    %cst_17 = arith.constant dense<0.000000e+00> : vector<8x128xf32>
    %23 = tpu.matmul %21, %22, %cst_17 {dimension_numbers = #tpu.dot_dimension_numbers<[1], [0], [0], [1], [0, 0, 1, 1], [], []>} : vector<8x128xbf16>, vector<128x128xbf16>, vector<8x128xf32> -> vector<8x128xf32>
    %c0_18 = arith.constant 0 : index
    %c0_19 = arith.constant 0 : index
    %24 = vector.load %arg8[%c0_18, %c0_19] : memref<1x128xf32, #tpu.memory_space<vmem>>, vector<1x128xf32>
    %25 = vector.broadcast %24 : vector<1x128xf32> to vector<8x128xf32>
    %26 = arith.addf %23, %25 : vector<8x128xf32>
    %27 = arith.truncf %26 : vector<8x128xf32> to vector<8x128xbf16>
    %c0_20 = arith.constant 0 : index
    %c0_21 = arith.constant 0 : index
    %28 = vector.load %arg9[%c0_20, %c0_21] : memref<128x384xbf16, #tpu.memory_space<vmem>>, vector<128x384xbf16>
    %cst_22 = arith.constant dense<0.000000e+00> : vector<8x384xf32>
    %29 = tpu.matmul %27, %28, %cst_22 {dimension_numbers = #tpu.dot_dimension_numbers<[1], [0], [0], [1], [0, 0, 1, 1], [], []>} : vector<8x128xbf16>, vector<128x384xbf16>, vector<8x384xf32> -> vector<8x384xf32>
    %c0_23 = arith.constant 0 : index
    %c0_24 = arith.constant 0 : index
    %30 = vector.load %arg10[%c0_23, %c0_24] : memref<1x384xf32, #tpu.memory_space<vmem>>, vector<1x384xf32>
    %31 = vector.broadcast %30 : vector<1x384xf32> to vector<8x384xf32>
    %32 = arith.addf %29, %31 : vector<8x384xf32>
    %33 = vector.extract_strided_slice %32 {offsets = [0, 0], sizes = [8, 128], strides = [1, 1]} : vector<8x384xf32> to vector<8x128xf32>
    %cst_25 = arith.constant 0.000000e+00 : f32
    %34 = vector.broadcast %cst_25 : f32 to vector<8x128xf32>
    %35 = arith.maximumf %33, %34 : vector<8x128xf32>
    %36 = vector.extract_strided_slice %32 {offsets = [0, 128], sizes = [8, 128], strides = [1, 1]} : vector<8x384xf32> to vector<8x128xf32>
    %cst_26 = arith.constant 0.000000e+00 : f32
    %37 = vector.broadcast %cst_26 : f32 to vector<8x128xf32>
    %38 = arith.maximumf %36, %37 : vector<8x128xf32>
    %39 = vector.extract_strided_slice %32 {offsets = [0, 256], sizes = [8, 128], strides = [1, 1]} : vector<8x384xf32> to vector<8x128xf32>
    %40 = arith.truncf %35 : vector<8x128xf32> to vector<8x128xbf16>
    %c0_27 = arith.constant 0 : index
    %c0_28 = arith.constant 0 : index
    %41 = vector.load %arg11[%c0_27, %c0_28] : memref<128x128xbf16, #tpu.memory_space<vmem>>, vector<128x128xbf16>
    %cst_29 = arith.constant dense<0.000000e+00> : vector<8x128xf32>
    %42 = tpu.matmul %40, %41, %cst_29 {dimension_numbers = #tpu.dot_dimension_numbers<[1], [0], [0], [1], [0, 0, 1, 1], [], []>} : vector<8x128xbf16>, vector<128x128xbf16>, vector<8x128xf32> -> vector<8x128xf32>
    %c0_30 = arith.constant 0 : index
    %c0_31 = arith.constant 0 : index
    %43 = vector.load %arg12[%c0_30, %c0_31] : memref<1x128xf32, #tpu.memory_space<vmem>>, vector<1x128xf32>
    %44 = vector.broadcast %43 : vector<1x128xf32> to vector<8x128xf32>
    %45 = arith.addf %42, %44 : vector<8x128xf32>
    %cst_32 = arith.constant 0.000000e+00 : f32
    %46 = vector.broadcast %cst_32 : f32 to vector<8x128xf32>
    %47 = arith.maximumf %45, %46 : vector<8x128xf32>
    %48 = arith.truncf %47 : vector<8x128xf32> to vector<8x128xbf16>
    %c0_33 = arith.constant 0 : index
    %c0_34 = arith.constant 0 : index
    %49 = vector.load %arg13[%c0_33, %c0_34] : memref<128x128xbf16, #tpu.memory_space<vmem>>, vector<128x128xbf16>
    %cst_35 = arith.constant dense<0.000000e+00> : vector<8x128xf32>
    %50 = tpu.matmul %48, %49, %cst_35 {dimension_numbers = #tpu.dot_dimension_numbers<[1], [0], [0], [1], [0, 0, 1, 1], [], []>} : vector<8x128xbf16>, vector<128x128xbf16>, vector<8x128xf32> -> vector<8x128xf32>
    %c0_36 = arith.constant 0 : index
    %c0_37 = arith.constant 0 : index
    %51 = vector.load %arg14[%c0_36, %c0_37] : memref<1x128xf32, #tpu.memory_space<vmem>>, vector<1x128xf32>
    %52 = vector.broadcast %51 : vector<1x128xf32> to vector<8x128xf32>
    %53 = arith.addf %50, %52 : vector<8x128xf32>
    %c0_38 = arith.constant 0 : index
    %c0_39 = arith.constant 0 : index
    %54 = vector.load %arg17[%c0_38, %c0_39] : memref<8x128xf32, #tpu.memory_space<vmem>>, vector<8x128xf32>
    tpu.vector_store %arg17[%c0_38, %c0_39], %53 {strides = array<i32>} : memref<8x128xf32, #tpu.memory_space<vmem>>, vector<8x128xf32>,
    %55 = arith.truncf %38 : vector<8x128xf32> to vector<8x128xbf16>
    %c0_40 = arith.constant 0 : index
    %c0_41 = arith.constant 0 : index
    %56 = vector.load %arg15[%c0_40, %c0_41] : memref<128x128xbf16, #tpu.memory_space<vmem>>, vector<128x128xbf16>
    %cst_42 = arith.constant dense<0.000000e+00> : vector<8x128xf32>
    %57 = tpu.matmul %55, %56, %cst_42 {dimension_numbers = #tpu.dot_dimension_numbers<[1], [0], [0], [1], [0, 0, 1, 1], [], []>} : vector<8x128xbf16>, vector<128x128xbf16>, vector<8x128xf32> -> vector<8x128xf32>
    %c0_43 = arith.constant 0 : index
    %c0_44 = arith.constant 0 : index
    %58 = vector.load %arg16[%c0_43, %c0_44] : memref<1x128xf32, #tpu.memory_space<vmem>>, vector<1x128xf32>
    %59 = vector.broadcast %58 : vector<1x128xf32> to vector<8x128xf32>
    %60 = arith.addf %57, %59 : vector<8x128xf32>
    %cst_45 = arith.constant 0.000000e+00 : f32
    %61 = vector.broadcast %cst_45 : f32 to vector<8x128xf32>
    %62 = arith.maximumf %60, %61 : vector<8x128xf32>
    %63 = arith.negf %62 : vector<8x128xf32>
    %64 = math.exp %63 : vector<8x128xf32>
    %cst_46 = arith.constant 1.000000e+00 : f32
    %65 = vector.broadcast %cst_46 : f32 to vector<8x128xf32>
    %66 = arith.addf %65, %64 : vector<8x128xf32>
    %67 = arith.divf %65, %66 : vector<8x128xf32>
    %68 = arith.mulf %26, %26 : vector<8x128xf32>
    %cst_47 = arith.constant dense<0.000000e+00> : vector<8xf32>
    %69 = vector.multi_reduction <add>, %68, %cst_47 [1] : vector<8x128xf32> to vector<8xf32>
    %70 = vector.shape_cast %69 : vector<8xf32> to vector<8x1xf32>
    %71 = vector.broadcast %70 : vector<8x1xf32> to vector<8x128xf32>
    %72 = arith.addf %71, %39 : vector<8x128xf32>
    %cst_48 = arith.constant 0.000000e+00 : f32
    %73 = vector.broadcast %cst_48 : f32 to vector<8x128xf32>
    %74 = arith.maximumf %72, %73 : vector<8x128xf32>
    %cst_49 = arith.constant 1.000000e+00 : f32
    %75 = vector.broadcast %cst_49 : f32 to vector<8x128xf32>
    %76 = arith.divf %74, %75 : vector<8x128xf32>
    %cst_50 = arith.constant 1.000000e+00 : f32
    %77 = vector.broadcast %cst_50 : f32 to vector<8x128xf32>
    %78 = arith.addf %77, %76 : vector<8x128xf32>
    %cst_51 = arith.constant 1.000000e+00 : f32
    %79 = vector.broadcast %cst_51 : f32 to vector<8x128xf32>
    %80 = arith.divf %79, %78 : vector<8x128xf32>
    %81 = tpu.iota {dimensions = array<i32: 1>} : vector<8x128xi32>
    %c8_i32 = arith.constant 8 : i32
    %82 = vector.broadcast %c8_i32 : i32 to vector<8x128xi32>
    %83 = arith.cmpi slt, %81, %82 : vector<8x128xi32>
    %cst_52 = arith.constant 0.000000e+00 : f32
    %84 = vector.broadcast %cst_52 : f32 to vector<8x128xf32>
    %85 = arith.select %83, %80, %84 : vector<8x128xi1>, vector<8x128xf32>
    %cst_53 = arith.constant dense<0.000000e+00> : vector<8xf32>
    %86 = vector.multi_reduction <add>, %85, %cst_53 [1] : vector<8x128xf32> to vector<8xf32>
    %87 = vector.shape_cast %86 : vector<8xf32> to vector<8x1xf32>
    %88 = tpu.reciprocal %87 {approx = true} : vector<8x1xf32> -> vector<8x1xf32>
    %89 = vector.broadcast %88 : vector<8x1xf32> to vector<8x128xf32>
    %90 = arith.mulf %85, %89 : vector<8x128xf32>
    %c8_i32_54 = arith.constant 8 : i32
    %91 = vector.broadcast %c8_i32_54 : i32 to vector<8x128xi32>
    %92 = arith.cmpi eq, %81, %91 : vector<8x128xi32>
    %93 = arith.select %92, %67, %90 : vector<8x128xi1>, vector<8x128xf32>
    %c0_55 = arith.constant 0 : index
    %c0_56 = arith.constant 0 : index
    %94 = vector.load %arg18[%c0_55, %c0_56] : memref<8x128xf32, #tpu.memory_space<vmem>>, vector<8x128xf32>
    tpu.vector_store %arg18[%c0_55, %c0_56], %93 {strides = array<i32>} : memref<8x128xf32, #tpu.memory_space<vmem>>, vector<8x128xf32>,
    return
  }
  func.func @transform_0(%arg0: i32) -> (i32, i32) {
    %c0_i32 = arith.constant 0 : i32
    %c0_i32_0 = arith.constant 0 : i32
    return %arg0, %c0_i32 : i32, i32
  }
  func.func @transform_1(%arg0: i32) -> (i32, i32) {
    %c0_i32 = arith.constant 0 : i32
    %c0_i32_0 = arith.constant 0 : i32
    return %arg0, %c0_i32 : i32, i32
  }
  func.func @transform_2(%arg0: i32) -> (i32, i32) {
    %c0_i32 = arith.constant 0 : i32
    %c0_i32_0 = arith.constant 0 : i32
    %c0_i32_1 = arith.constant 0 : i32
    return %c0_i32, %c0_i32_0 : i32, i32
  }
  func.func @transform_3(%arg0: i32) -> (i32, i32) {
    %c0_i32 = arith.constant 0 : i32
    %c0_i32_0 = arith.constant 0 : i32
    %c0_i32_1 = arith.constant 0 : i32
    return %c0_i32, %c0_i32_0 : i32, i32
  }
  func.func @transform_4(%arg0: i32) -> (i32, i32) {
    %c0_i32 = arith.constant 0 : i32
    %c0_i32_0 = arith.constant 0 : i32
    %c0_i32_1 = arith.constant 0 : i32
    return %c0_i32, %c0_i32_0 : i32, i32
  }
  func.func @transform_5(%arg0: i32) -> (i32, i32) {
    %c0_i32 = arith.constant 0 : i32
    %c0_i32_0 = arith.constant 0 : i32
    %c0_i32_1 = arith.constant 0 : i32
    return %c0_i32, %c0_i32_0 : i32, i32
  }
  func.func @transform_6(%arg0: i32) -> (i32, i32) {
    %c0_i32 = arith.constant 0 : i32
    %c0_i32_0 = arith.constant 0 : i32
    %c0_i32_1 = arith.constant 0 : i32
    return %c0_i32, %c0_i32_0 : i32, i32
  }
  func.func @transform_7(%arg0: i32) -> (i32, i32) {
    %c0_i32 = arith.constant 0 : i32
    %c0_i32_0 = arith.constant 0 : i32
    %c0_i32_1 = arith.constant 0 : i32
    return %c0_i32, %c0_i32_0 : i32, i32
  }
  func.func @transform_8(%arg0: i32) -> (i32, i32) {
    %c0_i32 = arith.constant 0 : i32
    %c0_i32_0 = arith.constant 0 : i32
    %c0_i32_1 = arith.constant 0 : i32
    return %c0_i32, %c0_i32_0 : i32, i32
  }
  func.func @transform_9(%arg0: i32) -> (i32, i32) {
    %c0_i32 = arith.constant 0 : i32
    %c0_i32_0 = arith.constant 0 : i32
    %c0_i32_1 = arith.constant 0 : i32
    return %c0_i32, %c0_i32_0 : i32, i32
  }
  func.func @transform_10(%arg0: i32) -> (i32, i32) {
    %c0_i32 = arith.constant 0 : i32
    %c0_i32_0 = arith.constant 0 : i32
    %c0_i32_1 = arith.constant 0 : i32
    return %c0_i32, %c0_i32_0 : i32, i32
  }
  func.func @transform_11(%arg0: i32) -> (i32, i32) {
    %c0_i32 = arith.constant 0 : i32
    %c0_i32_0 = arith.constant 0 : i32
    %c0_i32_1 = arith.constant 0 : i32
    return %c0_i32, %c0_i32_0 : i32, i32
  }
  func.func @transform_12(%arg0: i32) -> (i32, i32) {
    %c0_i32 = arith.constant 0 : i32
    %c0_i32_0 = arith.constant 0 : i32
    %c0_i32_1 = arith.constant 0 : i32
    return %c0_i32, %c0_i32_0 : i32, i32
  }
  func.func @transform_13(%arg0: i32) -> (i32, i32) {
    %c0_i32 = arith.constant 0 : i32
    %c0_i32_0 = arith.constant 0 : i32
    %c0_i32_1 = arith.constant 0 : i32
    return %c0_i32, %c0_i32_0 : i32, i32
  }
  func.func @transform_14(%arg0: i32) -> (i32, i32) {
    %c0_i32 = arith.constant 0 : i32
    %c0_i32_0 = arith.constant 0 : i32
    %c0_i32_1 = arith.constant 0 : i32
    return %c0_i32, %c0_i32_0 : i32, i32
  }
  func.func @transform_15(%arg0: i32) -> (i32, i32) {
    %c0_i32 = arith.constant 0 : i32
    %c0_i32_0 = arith.constant 0 : i32
    %c0_i32_1 = arith.constant 0 : i32
    return %c0_i32, %c0_i32_0 : i32, i32
  }
  func.func @transform_16(%arg0: i32) -> (i32, i32) {
    %c0_i32 = arith.constant 0 : i32
    %c0_i32_0 = arith.constant 0 : i32
    return %arg0, %c0_i32 : i32, i32
  }
  func.func @transform_17(%arg0: i32) -> (i32, i32) {
    %c0_i32 = arith.constant 0 : i32
    %c0_i32_0 = arith.constant 0 : i32
    return %arg0, %c0_i32 : i32, i32
  }
}

</mosaic_0001>

<bundles_post_ra>
// kernel: tpu_custom_call.1
= control target key start
LH: loop header
LB: loop body
LE: loop exit
PB: predicated region body
PF: predicated region fallthrough
CT: control target
= control target key end

     0   :  { %s2056_s0 = inlined_call_operand.hbm [shape: f32[8,128], index: 0, kind: input, shape index: {}]   ;;  %s2057_s1 = inlined_call_operand.hbm [shape: f32[8,128], index: 1, kind: input, shape index: {}]   ;;  %s2058_s2 = inlined_call_operand.hbm [shape: bf16[128,128], index: 2, kind: input, shape index: {}]   ;;  %s2059_s3 = inlined_call_operand.vmem [shape: f32[1,128], index: 3, kind: input, shape index: {}]   ;;  %s2060_s4 = inlined_call_operand.hbm [shape: bf16[128,128], index: 4, kind: input, shape index: {}]   ;;  %s2061_s5 = inlined_call_operand.vmem [shape: f32[1,128], index: 5, kind: input, shape index: {}]   ;;  %s2062_s6 = inlined_call_operand.hbm [shape: bf16[128,128], index: 6, kind: input, shape index: {}]   ;;  %s2063_s7 = inlined_call_operand.vmem [shape: f32[1,128], index: 7, kind: input, shape index: {}]   ;;  %s2064_s8 = inlined_call_operand.hbm [shape: bf16[128,384], index: 8, kind: input, shape index: {}]   ;;  %s2065_s9 = inlined_call_operand.vmem [shape: f32[1,384], index: 9, kind: input, shape index: {}]   ;;  %s2066_s10 = inlined_call_operand.hbm [shape: bf16[128,128], index: 10, kind: input, shape index: {}]   ;;  %s2067_s11 = inlined_call_operand.vmem [shape: f32[1,128], index: 11, kind: input, shape index: {}]   ;;  %s2068_s12 = inlined_call_operand.hbm [shape: bf16[128,128], index: 12, kind: input, shape index: {}]   ;;  %s2069_s13 = inlined_call_operand.vmem [shape: f32[1,128], index: 13, kind: input, shape index: {}]   ;;  %s2070_s14 = inlined_call_operand.hbm [shape: bf16[128,128], index: 14, kind: input, shape index: {}]   ;;  %s2071_s15 = inlined_call_operand.vmem [shape: f32[1,128], index: 15, kind: input, shape index: {}]   ;;  %s2072_s16 = inlined_call_operand.hbm [shape: f32[8,128], index: 16, kind: output, shape index: {0}]   ;;  %s2073_s17 = inlined_call_operand.hbm [shape: f32[8,128], index: 17, kind: output, shape index: {1}]  }
   0x1   :  { %2074 = sst [smem:[#allocation27_spill]] %s2056_s0 }
   0x2   :  { %2075 = sst [smem:[#allocation28_spill]] %s2057_s1 }
   0x3   :  { %23 = vsyncpa [#allocation3], 0 }
   0x4   :  { %24 = vsyncpa [#allocation6], 0 }
   0x5   :  { %25 = vsyncpa [#allocation9], 0 }
   0x6   :  { %26 = vsyncpa [#allocation12], 0 }
   0x7   :  { %27 = vsyncpa [#allocation15], 0 }
   0x8   :  { %28 = vsyncpa [#allocation4], 0 }
   0x9   :  { %29 = vsyncpa [#allocation19], 0  ;;  %s1798_s24 = smov [#allocation5]  }
   0xa   :  { %s46_s25 = sshll.u32 %s1798_s24, 4  ;;  %s47_s25 = int_to_ptr.vmem [resolvable:$true] %s46_s25 }
   0xb   :  { %s1572_s26 = scalar_lea.vmem %s47_s25, 128  ;;  %p1577_p1 = scmp.lt.s32.totalorder %s47_s25, %s47_s25 }
   0xc   :  { %p1573_p0 = scmp.ne.s32.totalorder %s47_s25, %s1572_s26  ;;  %p1578_p2 = scmp.lt.s32.totalorder %s1572_s26, %s1572_s26 }
   0xe   :  { %p1579_p3 = por %p1578_p2, %p1577_p1 }
  0x10   :  { %p1580_p4 = pnand %p1579_p3, %p1573_p0 }
  0x12   :  { %1583 = shalt.err (!%p1580_p4)
}
  0x13   :  { %s2076_s29 = sld [smem:[#allocation28_spill]]  ;;  %s1799_s0 = smov [#allocation8]  }
  0x14   :  { %s69_s30 = sshll.u32 %s1799_s0, 4  ;;  %s1800_s18 = smov [#allocation11]   ;;  %s70_s30 = int_to_ptr.vmem [resolvable:$true] %s69_s30 }
  0x15   :  { %s97_s19 = sshll.u32 %s1800_s18, 4  ;;  %s1592_s1 = scalar_lea.vmem %s70_s30, 1024  ;;  %s98_s19 = int_to_ptr.vmem [resolvable:$true] %s97_s19 }
  0x16   :  { %p1593_p5 = scmp.ne.s32.totalorder %s70_s30, %s1592_s1  ;;  %p1597_p6 = scmp.lt.s32.totalorder %s70_s30, %s70_s30 }
  0x17   :  { %p1598_p7 = scmp.lt.s32.totalorder %s1592_s1, %s1592_s1 }
  0x19   :  { %49 = dma.hbm_to_vmem [thread:$0]  %s2076_s29, 128, %s47_s25, [#allocation6]  }
  0x1a   :  { %p1599_p8 = por %p1598_p7, %p1597_p6 }
  0x1c   :  { %p1600_p9 = pnand %p1599_p8, %p1593_p5 }
  0x1e   :  { %1603 = shalt.err (!%p1600_p9)
}
  0x1f   :  { %s1801_s20 = smov 64   ;;  %s1802_s21 = smov 4  }
  0x20   :  { %75 = dma.hbm_to_vmem [thread:$0]  %s2060_s4, 1024, %s70_s30, [#allocation9], %s1801_s20, %s1801_s20, %s1802_s21  }
  0x21   :  { %s1612_s24 = scalar_lea.vmem %s98_s19, 3072  ;;  %p1617_p11 = scmp.lt.s32.totalorder %s98_s19, %s98_s19 }
  0x22   :  { %p1613_p10 = scmp.ne.s32.totalorder %s98_s19, %s1612_s24  ;;  %p1618_p12 = scmp.lt.s32.totalorder %s1612_s24, %s1612_s24 }
  0x24   :  { %p1619_p13 = por %p1618_p12, %p1617_p11 }
  0x26   :  { %p1620_p0 = pnand %p1619_p13, %p1613_p10 }
  0x28   :  { %1623 = shalt.err (!%p1620_p0)
}
  0x29   :  { %s1803_s25 = smov 192   ;;  %s1804_s26 = smov 12  }
  0x2a   :  { %103 = dma.hbm_to_vmem [thread:$0]  %s2064_s8, 3072, %s98_s19, [#allocation12], %s1803_s25, %s1803_s25, %s1804_s26  }
  0x2b   :  { %s1805_s29 = smov [#allocation14]   ;;  %s1806_s18 = smov [#allocation2]  }
  0x2c   :  { %s125_s0 = sshll.u32 %s1805_s29, 4  ;;  %s36_s1 = sshll.u32 %s1806_s18, 4  ;;  %s126_s0 = int_to_ptr.vmem [resolvable:$true] %s125_s0  ;;  %s37_s1 = int_to_ptr.vmem [resolvable:$true] %s36_s1 }
  0x2d   :  { %s1632_s4 = scalar_lea.vmem %s126_s0, 1024  ;;  %p1637_p2 = scmp.lt.s32.totalorder %s126_s0, %s126_s0 }
  0x2e   :  { %p1633_p1 = scmp.ne.s32.totalorder %s126_s0, %s1632_s4  ;;  %p1638_p3 = scmp.lt.s32.totalorder %s1632_s4, %s1632_s4 }
  0x30   :  { %p1639_p4 = por %p1638_p3, %p1637_p2 }
  0x32   :  { %p1640_p5 = pnand %p1639_p4, %p1633_p1 }
  0x34   :  { %1643 = shalt.err (!%p1640_p5)
}
  0x35   :  { %131 = dma.hbm_to_vmem [thread:$0]  %s2068_s12, 1024, %s126_s0, [#allocation15], %s1801_s20, %s1801_s20, %s1802_s21  }
  0x36   :  { %s1652_s8 = scalar_lea.vmem %s37_s1, 128  ;;  %p1657_p7 = scmp.lt.s32.totalorder %s37_s1, %s37_s1 }
  0x37   :  { %p1653_p6 = scmp.ne.s32.totalorder %s37_s1, %s1652_s8  ;;  %p1658_p8 = scmp.lt.s32.totalorder %s1652_s8, %s1652_s8 }
  0x39   :  { %p1659_p9 = por %p1658_p8, %p1657_p7 }
  0x3b   :  { %p1660_p10 = pnand %p1659_p9, %p1653_p6 }
  0x3d   :  { %1663 = shalt.err (!%p1660_p10)
}
  0x3e   :  { %s2077_s24 = sld [smem:[#allocation27_spill]]  ;;  %s1807_s25 = smov [#allocation7]  }
  0x3f   :  { %s55_s26 = sshll.u32 %s1807_s25, 4  ;;  %s1808_s27 = smov [#allocation10]   ;;  %s56_s26 = int_to_ptr.vmem [resolvable:$true] %s55_s26 }
  0x40   :  { %s83_s28 = sshll.u32 %s1808_s27, 4  ;;  %s1672_s29 = scalar_lea.vmem %s56_s26, 1024  ;;  %s84_s28 = int_to_ptr.vmem [resolvable:$true] %s83_s28 }
  0x41   :  { %p1673_p11 = scmp.ne.s32.totalorder %s56_s26, %s1672_s29  ;;  %p1677_p12 = scmp.lt.s32.totalorder %s56_s26, %s56_s26 }
  0x42   :  { %p1678_p13 = scmp.lt.s32.totalorder %s1672_s29, %s1672_s29 }
  0x44   :  { %39 = dma.hbm_to_vmem [thread:$0]  %s2077_s24, 128, %s37_s1, [#allocation3]  }
  0x45   :  { %p1679_p0 = por %p1678_p13, %p1677_p12 }
  0x47   :  { %p1680_p1 = pnand %p1679_p0, %p1673_p11 }
  0x49   :  { %1683 = shalt.err (!%p1680_p1)
}
  0x4a   :  { %61 = dma.hbm_to_vmem [thread:$0]  %s2058_s2, 1024, %s56_s26, [#allocation6], %s1801_s20, %s1801_s20, %s1802_s21  }
  0x4b   :  { %s1692_s18 = scalar_lea.vmem %s84_s28, 1024  ;;  %p1697_p3 = scmp.lt.s32.totalorder %s84_s28, %s84_s28 }
  0x4c   :  { %p1693_p2 = scmp.ne.s32.totalorder %s84_s28, %s1692_s18  ;;  %p1698_p4 = scmp.lt.s32.totalorder %s1692_s18, %s1692_s18 }
  0x4e   :  { %p1699_p5 = por %p1698_p4, %p1697_p3 }
  0x50   :  { %p1700_p6 = pnand %p1699_p5, %p1693_p2 }
  0x52   :  { %1703 = shalt.err (!%p1700_p6)
}
  0x53   :  { %89 = dma.hbm_to_vmem [thread:$0]  %s2062_s6, 1024, %s84_s28, [#allocation9], %s1801_s20, %s1801_s20, %s1802_s21  }
  0x54   :  { %s1809_s30 = smov [#allocation13]   ;;  %s1810_s8 = smov [#allocation16]  }
  0x55   :  { %s111_s22 = sshll.u32 %s1809_s30, 4  ;;  %s139_s2 = sshll.u32 %s1810_s8, 4  ;;  %s112_s22 = int_to_ptr.vmem [resolvable:$true] %s111_s22  ;;  %s140_s2 = int_to_ptr.vmem [resolvable:$true] %s139_s2 }
  0x56   :  { %s1712_s19 = scalar_lea.vmem %s112_s22, 1024  ;;  %p1717_p8 = scmp.lt.s32.totalorder %s112_s22, %s112_s22 }
  0x57   :  { %p1713_p7 = scmp.ne.s32.totalorder %s112_s22, %s1712_s19  ;;  %p1718_p9 = scmp.lt.s32.totalorder %s1712_s19, %s1712_s19 }
  0x59   :  { %p1719_p10 = por %p1718_p9, %p1717_p8 }
  0x5b   :  { %p1720_p11 = pnand %p1719_p10, %p1713_p7 }
  0x5d   :  { %1723 = shalt.err (!%p1720_p11)
}
  0x5e   :  { %117 = dma.hbm_to_vmem [thread:$0]  %s2066_s10, 1024, %s112_s22, [#allocation12], %s1801_s20, %s1801_s20, %s1802_s21  }
  0x5f   :  { %s1732_s6 = scalar_lea.vmem %s140_s2, 1024  ;;  %p1737_p13 = scmp.lt.s32.totalorder %s140_s2, %s140_s2 }
  0x60   :  { %p1733_p12 = scmp.ne.s32.totalorder %s140_s2, %s1732_s6  ;;  %p1738_p0 = scmp.lt.s32.totalorder %s1732_s6, %s1732_s6 }
  0x62   :  { %p1739_p1 = por %p1738_p0, %p1737_p13 }
  0x64   :  { %p1740_p2 = pnand %p1739_p1, %p1733_p12 }
  0x66   :  { %1743 = shalt.err (!%p1740_p2)
}
  0x67   :  { %145 = dma.hbm_to_vmem [thread:$0]  %s2070_s14, 1024, %s140_s2, [#allocation15], %s1801_s20, %s1801_s20, %s1802_s21  }
  0x68   :  { %1784 = dma.done.wait [#allocation3], 128  }
  0x69   :  { %1785 = vsyncadd [#allocation3], 4294967168 }
  0x6a   :  { %1786 = dma.done.wait [#allocation6], 1152  }
  0x6b   :  { %1787 = vsyncadd [#allocation6], 4294966144 }
  0x6c   :  { %1788 = dma.done.wait [#allocation9], 2048  }
  0x6d   :  { %1789 = vsyncadd [#allocation9], 4294965248 }
  0x6e   :  { %1790 = dma.done.wait [#allocation12], 4096  }
  0x6f   :  { %1791 = vsyncadd [#allocation12], 4294963200 }
  0x70   :  { %1792 = dma.done.wait [#allocation15], 2048  }
  0x71   :  { %1793 = vsyncadd [#allocation15], 4294965248  ;;  %v1811_v0 = vmov 0.0   ;;  %vm1812_vm0 = vmmov 0   ;;  %v1476_v1 = vld [vmem:[#allocation7 + $0x38] sm:$0xff]   ;;  %v1477_v2 = vld [vmem:[#allocation7 + $0x30] sm:$0xff]  }
  0x72   :  { %1318 = vmatprep.subr.bf16.mxu0 %v1811_v0  ;;  %1334 = vmatprep.mubr.msk.bf16.mxu0 %vm1812_vm0, %v1811_v0  ;;  %v1478_v3 = vld [vmem:[#allocation7 + $0x28] sm:$0xff]   ;;  %v1479_v4 = vld [vmem:[#allocation7 + $0x20] sm:$0xff]   ;;  %v177_v5 = vld [vmem:[#allocation5] sm:$0xff] }
  0x73   :  { %1338 = vmatprep.subr.bf16.mxu1 %v1811_v0  ;;  %1354 = vmatprep.mubr.msk.bf16.mxu1 %vm1812_vm0, %v1811_v0  ;;  %v1484_v6 = vld [vmem:[#allocation8 + $0x38] sm:$0xff]   ;;  %v1485_v7 = vld [vmem:[#allocation8 + $0x30] sm:$0xff]   ;;  %v178_v9 = vmul.f32 0.1, %v177_v5  ;;  %v1486_v10 = vld [vmem:[#allocation8 + $0x28] sm:$0xff]  }
  0x74   :  { %1319 = vmatpush3.bf16.msra.mxu0 %v1476_v1  ;;  %1339 = vmatpush3.bf16.msra.mxu1 %v1484_v6  ;;  %v1480_v8 = vld [vmem:[#allocation7 + $0x18] sm:$0xff]   ;;  %v1481_v11 = vld [vmem:[#allocation7 + $0x10] sm:$0xff]   ;;  %v1487_v12 = vld [vmem:[#allocation8 + $0x20] sm:$0xff]  }
  0x75   :  { %1320 = vmatprep.subr.bf16.mxu0 %v1811_v0  ;;  %1340 = vmatprep.subr.bf16.mxu1 %v1811_v0  ;;  %v1482_v13 = vld [vmem:[#allocation7 + $0x8] sm:$0xff]   ;;  %v176_v14 = vld [vmem:[#allocation2] sm:$0xff]  ;;  %v1488_v15 = vld [vmem:[#allocation8 + $0x18] sm:$0xff]  }
  0x76   :  { %v1483_v16 = vld [vmem:[#allocation7] sm:$0xff]   ;;  %v179_v17 = vadd.f32 %v178_v9, %v176_v14  ;;  %v1489_v18 = vld [vmem:[#allocation8 + $0x10] sm:$0xff]   ;;  %v1490_v20 = vld [vmem:[#allocation8 + $0x8] sm:$0xff]  }
  0x77   :  { %v1491_v21 = vld [vmem:[#allocation8] sm:$0xff]   ;;  %v1492_v22 = vld [vmem:[#allocation10 + $0x38] sm:$0xff]   ;;  %v1493_v23 = vld [vmem:[#allocation10 + $0x30] sm:$0xff]  }
  0x78   :  { %1321 = vmatpush3.bf16.msra.mxu0 %v1477_v2  ;;  %1341 = vmatpush3.bf16.msra.mxu1 %v1485_v7  ;;  %v180_v19 = vpack.c.bf16 %v179_v17, %v179_v17  ;;  %v1494_v24 = vld [vmem:[#allocation10 + $0x28] sm:$0xff]   ;;  %v1495_v25 = vld [vmem:[#allocation10 + $0x20] sm:$0xff]   ;;  %v1496_v26 = vld [vmem:[#allocation10 + $0x18] sm:$0xff]   ;;  %v1813_v7 = vmov 0  }
  0x79   :  { %1322 = vmatprep.subr.bf16.mxu0 %v1811_v0  ;;  %1342 = vmatprep.subr.bf16.mxu1 %v1811_v0  ;;  %v1497_v27 = vld [vmem:[#allocation10 + $0x10] sm:$0xff]   ;;  %v1498_v36 = vld [vmem:[#allocation10 + $0x8] sm:$0xff]   ;;  %v1499_v37 = vld [vmem:[#allocation10] sm:$0xff]  }
  0x7a   :  { %v1176_v28 = vld [vmem:[%s2059_s3] ss:$0 sm:$0xff]  ;;  %v1500_v38 = vld [vmem:[#allocation11 + $0xa8] ss:$12 sps:$4 sm:$0xff]   ;;  %v1502_v39 = vld [vmem:[#allocation11 + $0xac] ss:$12 sps:$4 sm:$0xff]  }
  0x7b   :  { %v1506_v40 = vld [vmem:[#allocation11 + $0x94] ss:$12 sps:$4 sm:$0xff]   ;;  %v1504_v41 = vld [vmem:[#allocation11 + $0x90] ss:$12 sps:$4 sm:$0xff]   ;;  %v1508_v43 = vld [vmem:[#allocation11 + $0x78] ss:$12 sps:$4 sm:$0xff]  }
  0x7c   :  { %1323 = vmatpush3.bf16.msra.mxu0 %v1478_v3  ;;  %1343 = vmatpush3.bf16.msra.mxu1 %v1486_v10  ;;  %v1510_v42 = vld [vmem:[#allocation11 + $0x7c] ss:$12 sps:$4 sm:$0xff]   ;;  %v1514_v44 = vld [vmem:[#allocation11 + $0x64] ss:$12 sps:$4 sm:$0xff]   ;;  %v1512_v45 = vld [vmem:[#allocation11 + $0x60] ss:$12 sps:$4 sm:$0xff]  }
  0x7d   :  { %1324 = vmatprep.subr.bf16.mxu0 %v1811_v0  ;;  %1344 = vmatprep.subr.bf16.mxu1 %v1811_v0  ;;  %v1518_v46 = vld [vmem:[#allocation11 + $0x4c] ss:$12 sps:$4 sm:$0xff]   ;;  %v1516_v47 = vld [vmem:[#allocation11 + $0x48] ss:$12 sps:$4 sm:$0xff]   ;;  %v1520_v49 = vld [vmem:[#allocation11 + $0x30] ss:$12 sps:$4 sm:$0xff]  }
  0x7e   :  { %v1522_v48 = vld [vmem:[#allocation11 + $0x34] ss:$12 sps:$4 sm:$0xff]   ;;  %v1526_v50 = vld [vmem:[#allocation11 + $0x1c] ss:$12 sps:$4 sm:$0xff]   ;;  %v1524_v51 = vld [vmem:[#allocation11 + $0x18] ss:$12 sps:$4 sm:$0xff]  }
  0x7f   :  { %v1185_v52 = vld [vmem:[%s2061_s5] ss:$0 sm:$0xff]  ;;  %v1507_v61 = vld [vmem:[#allocation11 + $0x98] ss:$12 sps:$4 sm:$0xff]   ;;  %v1511_v62 = vld [vmem:[#allocation11 + $0x80] ss:$12 sps:$4 sm:$0xff]  }
  0x80   :  { %1325 = vmatpush3.bf16.msra.mxu0 %v1479_v4  ;;  %1345 = vmatpush3.bf16.msra.mxu1 %v1487_v12  ;;  %v1503_v58 = vld [vmem:[#allocation11 + $0xb0] ss:$12 sps:$4 sm:$0xff]   ;;  %v1515_v63 = vld [vmem:[#allocation11 + $0x68] ss:$12 sps:$4 sm:$0xff]   ;;  %v1523_v2 = vld [vmem:[#allocation11 + $0x38] ss:$12 sps:$4 sm:$0xff]  }
  0x81   :  { %1326 = vmatprep.subr.bf16.mxu0 %v1811_v0  ;;  %1346 = vmatprep.subr.bf16.mxu1 %v1811_v0  ;;  %v1519_v1 = vld [vmem:[#allocation11 + $0x50] ss:$12 sps:$4 sm:$0xff]   ;;  %v1527_v3 = vld [vmem:[#allocation11 + $0x20] ss:$12 sps:$4 sm:$0xff]   ;;  %v1531_v6 = vld [vmem:[#allocation11 + $0x8] ss:$12 sps:$4 sm:$0xff]  }
  0x82   :  { %v1530_v4 = vld [vmem:[#allocation11 + $0x4] ss:$12 sps:$4 sm:$0xff]   ;;  %v1528_v5 = vld [vmem:[#allocation11] ss:$12 sps:$4 sm:$0xff]  }
  0x83   :  { %v1533_v17 = vld [vmem:[#allocation13 + $0x30] sm:$0xff]  }
  0x84   :  { %1327 = vmatpush3.bf16.msra.mxu0 %v1480_v8  ;;  %1347 = vmatpush3.bf16.msra.mxu1 %v1488_v15  ;;  %v1194_v8 = vld [vmem:[%s2063_s7] ss:$0 sm:$0xff] }
  0x85   :  { %1328 = vmatprep.subr.bf16.mxu0 %v1811_v0  ;;  %1348 = vmatprep.subr.bf16.mxu1 %v1811_v0 }
  0x88   :  { %1329 = vmatpush3.bf16.msra.mxu0 %v1481_v11  ;;  %1349 = vmatpush3.bf16.msra.mxu1 %v1489_v18  ;;  %v1534_v18 = vld [vmem:[#allocation13 + $0x28] sm:$0xff]  }
  0x89   :  { %1330 = vmatprep.subr.bf16.mxu0 %v1811_v0  ;;  %1350 = vmatprep.subr.bf16.mxu1 %v1811_v0 }
  0x8c   :  { %1331 = vmatpush3.bf16.msra.mxu0 %v1482_v13  ;;  %1351 = vmatpush3.bf16.msra.mxu1 %v1490_v20  ;;  %v1536_v20 = vld [vmem:[#allocation13 + $0x18] sm:$0xff]  }
  0x8d   :  { %1332 = vmatprep.subr.bf16.mxu0 %v1811_v0  ;;  %1352 = vmatprep.subr.bf16.mxu1 %v1811_v0 }
  0x90   :  { %1333 = vmatpush3.bf16.msra.mxu0 %v1483_v16  ;;  %1353 = vmatpush3.bf16.msra.mxu1 %v1491_v21  ;;  %v1532_v16 = vld [vmem:[#allocation13 + $0x38] sm:$0xff]   ;;  %v1537_v21 = vld [vmem:[#allocation13 + $0x10] sm:$0xff]  }
  0x91   :  { %1358 = vmatprep.subr.bf16.mxu0 %v1811_v0  ;;  %696 = vmatprep.subr.bf16.mxu1 %v1502_v39 }
  0x93   :  { %1335 = vmatmul.mubr.bf16.vlgmr.msra.gmra.mxu0 %v180_v19  ;;  %v1535_v19 = vld [vmem:[#allocation13 + $0x20] sm:$0xff]  }
  0x94   :  { %1374 = vmatprep.mubr.msk.bf16.mxu0 %vm1812_vm0, %v1811_v0  ;;  %1359 = vmatpush3.bf16.msra.mxu0 %v1492_v22  ;;  %v1538_v22 = vld [vmem:[#allocation13 + $0x8] sm:$0xff]  }
  0x95   :  { %1360 = vmatprep.subr.bf16.mxu0 %v1811_v0 }
  0x98   :  { %1361 = vmatpush3.bf16.msra.mxu0 %v1493_v23  ;;  %v1539_v23 = vld [vmem:[#allocation13] sm:$0xff]  }
  0x99   :  { %1362 = vmatprep.subr.bf16.mxu0 %v1811_v0 }
  0x9c   :  { %1363 = vmatpush3.bf16.msra.mxu0 %v1494_v24  ;;  %v553_v24 = vlaneseq }
  0x9d   :  { %1364 = vmatprep.subr.bf16.mxu0 %v1811_v0 }
  0xa0   :  { %1365 = vmatpush3.bf16.msra.mxu0 %v1495_v25  ;;  %v554_v25 = vshrl.u32 %v553_v24, 7 }
  0xa1   :  { %1366 = vmatprep.subr.bf16.mxu0 %v1811_v0 }
  0xa4   :  { %1367 = vmatpush3.bf16.msra.mxu0 %v1496_v26  ;;  %v555_v26 = vsub.s32 0, %v554_v25 }
  0xa5   :  { %1368 = vmatprep.subr.bf16.mxu0 %v1811_v0 }
  0xa8   :  { %1369 = vmatpush3.bf16.msra.mxu0 %v1497_v27  ;;  %v551_v27 = vld [vmem:[%s2065_s9] sm:$0x7] }
  0xa9   :  { %1370 = vmatprep.subr.bf16.mxu0 %v1811_v0 }
  0xac   :  { %1371 = vmatpush3.bf16.msra.mxu0 %v1498_v36 }
  0xad   :  { %1372 = vmatprep.subr.bf16.mxu0 %v1811_v0 }
  0xb0   :  { %1373 = vmatpush3.bf16.msra.mxu0 %v1499_v37 }
  0xb1   :  { %1378 = vmatprep.subr.bf16.mxu0 %v1811_v0 }
 0x153   :  { %v286_v29 = vpop.f32.mrf.mxu0 }
 0x154   :  { %v287_v30 = vadd.f32 %v1176_v28, %v286_v29  ;;  %v563_v28 = vsub.s32 2, %v554_v25  ;;  %v556_v29 = vrot.slane %v551_v27, %v555_v26 }
 0x155   :  { %v1336_v31 = vpop.f32.mrf.mxu0 }
 0x156   :  { %v292_v32 = vmax.f32 %v287_v30, 0.0  ;;  %v564_v30 = vrot.slane %v551_v27, %v563_v28 }
 0x157   :  { %v289_v33 = vpop.f32.mrf.mxu0 }
 0x158   :  { %v293_v34 = vpack.c.bf16 %v292_v32, %v292_v32 }
 0x159   :  { %v1337_v35 = vpop.f32.mrf.mxu0 }
 0x15a   :  { %1355 = vmatmul.mubr.bf16.vlgmr.msra.gmra.mxu1 %v293_v34 }
 0x15b   :  { %697 = vmatpush1.bf16.msra.mxu1 %v1500_v38  ;;  %728 = vmatprep.mubr.bf16.mxu1 %v1813_v7  ;;  %v1555_v7 = vld [vmem:[#allocation14] sm:$0xff]  }
 0x15c   :  { %698 = vmatprep.subr.bf16.mxu1 %v1506_v40 }
 0x15f   :  { %699 = vmatpush1.bf16.msra.mxu1 %v1504_v41  ;;  %v1540_v41 = vld [vmem:[#allocation16 + $0x38] sm:$0xff]  }
 0x160   :  { %700 = vmatprep.subr.bf16.mxu1 %v1510_v42 }
 0x163   :  { %701 = vmatpush1.bf16.msra.mxu1 %v1508_v43 }
 0x164   :  { %702 = vmatprep.subr.bf16.mxu1 %v1514_v44 }
 0x167   :  { %703 = vmatpush1.bf16.msra.mxu1 %v1512_v45 }
 0x168   :  { %704 = vmatprep.subr.bf16.mxu1 %v1518_v46 }
 0x16b   :  { %705 = vmatpush1.bf16.msra.mxu1 %v1516_v47 }
 0x16c   :  { %706 = vmatprep.subr.bf16.mxu1 %v1522_v48  ;;  %v1541_v48 = vld [vmem:[#allocation16 + $0x30] sm:$0xff]  }
 0x16f   :  { %707 = vmatpush1.bf16.msra.mxu1 %v1520_v49  ;;  %v1542_v49 = vld [vmem:[#allocation16 + $0x28] sm:$0xff]  }
 0x170   :  { %708 = vmatprep.subr.bf16.mxu1 %v1526_v50  ;;  %v1543_v50 = vld [vmem:[#allocation16 + $0x20] sm:$0xff]  }
 0x173   :  { %709 = vmatpush1.bf16.msra.mxu1 %v1524_v51  ;;  %v2022_v51 = vand.u32 127, %v553_v24 }
 0x174   :  { %710 = vmatprep.subr.bf16.mxu1 %v1530_v4  ;;  %v1552_v4 = vld [vmem:[#allocation14 + $0x18] sm:$0xff]  }
 0x175   :  { %vm1134_vm1 = vcmp.lt.s32.totalorder %v2022_v51, 8  ;;  %vm1140_vm2 = vcmp.eq.s32.totalorder %v2022_v51, 8 }
 0x177   :  { %711 = vmatpush1.bf16.msra.mxu1 %v1528_v5  ;;  %v1553_v5 = vld [vmem:[#allocation14 + $0x10] sm:$0xff]  }
 0x178   :  { %1398 = vmatprep.subr.bf16.mxu1 %v1811_v0 }
 0x21a   :  { %v399_v53 = vpop.f32.mrf.mxu1 }
 0x21b   :  { %v400_v54 = vadd.f32 %v1185_v52, %v399_v53  ;;  %v1544_v52 = vld [vmem:[#allocation16 + $0x18] sm:$0xff]   ;;  %v559_v53 = vsub.s32 1, %v554_v25 }
 0x21c   :  { %v1356_v55 = vpop.f32.mrf.mxu1 }
 0x21d   :  { %v405_v56 = vmax.f32 %v400_v54, 0.0 }
 0x21e   :  { %v402_v57 = vpop.f32.mrf.mxu1 }
 0x21f   :  { %v406_v59 = vpack.c.bf16 %v405_v56, %v405_v56  ;;  %v1545_v56 = vld [vmem:[#allocation16 + $0x10] sm:$0xff]   ;;  %v560_v57 = vrot.slane %v551_v27, %v559_v53 }
 0x220   :  { %v1357_v60 = vpop.f32.mrf.mxu1 }
 0x221   :  { %1375 = vmatmul.mubr.bf16.vlgmr.msra.gmra.mxu0 %v406_v59  ;;  %v1547_v60 = vld [vmem:[#allocation16] sm:$0xff]  }
 0x222   :  { %1379 = vmatpush3.bf16.msra.mxu0 %v1503_v58  ;;  %1394 = vmatprep.mubr.msk.bf16.mxu0 %vm1812_vm0, %v1811_v0  ;;  %v1546_v58 = vld [vmem:[#allocation16 + $0x8] sm:$0xff]  }
 0x223   :  { %1380 = vmatprep.subr.bf16.mxu0 %v1811_v0 }
 0x226   :  { %1381 = vmatpush3.bf16.msra.mxu0 %v1507_v61 }
 0x227   :  { %1382 = vmatprep.subr.bf16.mxu0 %v1811_v0 }
 0x22a   :  { %1383 = vmatpush3.bf16.msra.mxu0 %v1511_v62  ;;  %v1548_v62 = vld [vmem:[#allocation14 + $0x38] sm:$0xff]  }
 0x22b   :  { %1384 = vmatprep.subr.bf16.mxu0 %v1811_v0 }
 0x22e   :  { %1385 = vmatpush3.bf16.msra.mxu0 %v1515_v63 }
 0x22f   :  { %1386 = vmatprep.subr.bf16.mxu0 %v1811_v0 }
 0x232   :  { %1387 = vmatpush3.bf16.msra.mxu0 %v1519_v1  ;;  %v1549_v1 = vld [vmem:[#allocation14 + $0x30] sm:$0xff]  }
 0x233   :  { %1388 = vmatprep.subr.bf16.mxu0 %v1811_v0 }
 0x236   :  { %1389 = vmatpush3.bf16.msra.mxu0 %v1523_v2  ;;  %v1550_v2 = vld [vmem:[#allocation14 + $0x28] sm:$0xff]  }
 0x237   :  { %1390 = vmatprep.subr.bf16.mxu0 %v1811_v0 }
 0x23a   :  { %1391 = vmatpush3.bf16.msra.mxu0 %v1527_v3  ;;  %v1551_v3 = vld [vmem:[#allocation14 + $0x20] sm:$0xff]  }
 0x23b   :  { %1392 = vmatprep.subr.bf16.mxu0 %v1811_v0 }
 0x23e   :  { %1393 = vmatpush3.bf16.msra.mxu0 %v1531_v6  ;;  %v1554_v6 = vld [vmem:[#allocation14 + $0x8] sm:$0xff]  }
 0x23f   :  { %1418 = vmatprep.subr.bf16.mxu0 %v1811_v0 }
 0x2e1   :  { %v512_v9 = vpop.f32.mrf.mxu0 }
 0x2e2   :  { %v513_v10 = vadd.f32 %v1194_v8, %v512_v9  ;;  %v1227_v8 = vld [vmem:[%s2067_s11] ss:$0 sm:$0xff]  ;;  %s1814_s11 = smov [#allocation18]  }
 0x2e3   :  { %v1376_v11 = vpop.f32.mrf.mxu0 }
 0x2e4   :  { %v518_v12 = vpack.c.bf16 %v513_v10, %v513_v10  ;;  %v1124_v13 = vmul.f32 %v513_v10, %v513_v10 }
 0x2e5   :  { %v515_v14 = vpop.f32.mrf.mxu0 }
 0x2e6   :  { %1125 = vadd.xlane.f32.xlu0 %v1124_v13  ;;  %729 = vmatmul.mubr.bf16.vlgmr.msra.gmra.mxu1 %v518_v12 }
 0x2e7   :  { %1395 = vmatmul.mubr.bf16.vlgmr.msra.gmra.mxu0 %v518_v12  ;;  %v1377_v15 = vpop.f32.mrf.mxu0  ;;  %1414 = vmatprep.mubr.msk.bf16.mxu1 %vm1812_vm0, %v1811_v0 }
 0x2e8   :  { %1434 = vmatprep.mubr.msk.bf16.mxu0 %vm1812_vm0, %v1811_v0  ;;  %1399 = vmatpush3.bf16.msra.mxu1 %v1532_v16  ;;  %v1245_v16 = vld [vmem:[%s2071_s15] ss:$0 sm:$0xff]  ;;  %s1159_s15 = sshll.u32 %s1814_s11, 4  ;;  %s1160_s15 = int_to_ptr.vmem [resolvable:$true] %s1159_s15 }
 0x2e9   :  { %1400 = vmatprep.subr.bf16.mxu1 %v1811_v0  ;;  %1419 = vmatpush3.bf16.msra.mxu0 %v1548_v62  ;;  %s1744_s0 = scalar_lea.vmem %s1160_s15, 128  ;;  %p1749_p4 = scmp.lt.s32.totalorder %s1160_s15, %s1160_s15 }
 0x2ea   :  { %1420 = vmatprep.subr.bf16.mxu0 %v1811_v0  ;;  %p1745_p3 = scmp.ne.s32.totalorder %s1160_s15, %s1744_s0  ;;  %p1750_p5 = scmp.lt.s32.totalorder %s1744_s0, %s1744_s0 }
 0x2ec   :  { %1401 = vmatpush3.bf16.msra.mxu1 %v1533_v17  ;;  %p1751_p6 = por %p1750_p5, %p1749_p4 }
 0x2ed   :  { %1402 = vmatprep.subr.bf16.mxu1 %v1811_v0  ;;  %1421 = vmatpush3.bf16.msra.mxu0 %v1549_v1 }
 0x2ee   :  { %1422 = vmatprep.subr.bf16.mxu0 %v1811_v0  ;;  %p1752_p7 = pnand %p1751_p6, %p1745_p3 }
 0x2f0   :  { %1403 = vmatpush3.bf16.msra.mxu1 %v1534_v18 }
 0x2f1   :  { %1404 = vmatprep.subr.bf16.mxu1 %v1811_v0  ;;  %1423 = vmatpush3.bf16.msra.mxu0 %v1550_v2 }
 0x2f2   :  { %1424 = vmatprep.subr.bf16.mxu0 %v1811_v0 }
 0x2f4   :  { %1405 = vmatpush3.bf16.msra.mxu1 %v1535_v19 }
 0x2f5   :  { %1406 = vmatprep.subr.bf16.mxu1 %v1811_v0  ;;  %1425 = vmatpush3.bf16.msra.mxu0 %v1551_v3 }
 0x2f6   :  { %1426 = vmatprep.subr.bf16.mxu0 %v1811_v0 }
 0x2f8   :  { %1407 = vmatpush3.bf16.msra.mxu1 %v1536_v20 }
 0x2f9   :  { %1408 = vmatprep.subr.bf16.mxu1 %v1811_v0  ;;  %1427 = vmatpush3.bf16.msra.mxu0 %v1552_v4 }
 0x2fa   :  { %1428 = vmatprep.subr.bf16.mxu0 %v1811_v0 }
 0x2fc   :  { %1409 = vmatpush3.bf16.msra.mxu1 %v1537_v21 }
 0x2fd   :  { %1410 = vmatprep.subr.bf16.mxu1 %v1811_v0  ;;  %1429 = vmatpush3.bf16.msra.mxu0 %v1553_v5 }
 0x2fe   :  { %1430 = vmatprep.subr.bf16.mxu0 %v1811_v0 }
 0x300   :  { %1411 = vmatpush3.bf16.msra.mxu1 %v1538_v22 }
 0x301   :  { %1412 = vmatprep.subr.bf16.mxu1 %v1811_v0  ;;  %1431 = vmatpush3.bf16.msra.mxu0 %v1554_v6 }
 0x302   :  { %1432 = vmatprep.subr.bf16.mxu0 %v1811_v0 }
 0x304   :  { %1413 = vmatpush3.bf16.msra.mxu1 %v1539_v23 }
 0x305   :  { %1438 = vmatprep.subr.bf16.mxu1 %v1811_v0  ;;  %1433 = vmatpush3.bf16.msra.mxu0 %v1555_v7 }
 0x36f   :  { %v1126_v36 = vpop.xlane.xlu0 %1125 }
 0x3a6   :  { %v730_v31 = vpop.f32.mrf.mxu1 }
 0x3a7   :  { %v731_v32 = vadd.f32 %v730_v31, %v556_v29  ;;  %v771_v33 = vpop.f32.mrf.mxu0 }
 0x3a8   :  { %v772_v34 = vadd.f32 %v771_v33, %v564_v30  ;;  %v732_v35 = vpop.f32.mrf.mxu1 }
 0x3a9   :  { %v777_v37 = vmax.f32 %v731_v32, 0.0  ;;  %v1396_v38 = vpop.f32.mrf.mxu0  ;;  %v733_v59 = vadd.f32 %v732_v35, %v560_v57 }
 0x3aa   :  { %v1127_v39 = vadd.f32 %v1126_v36, %v772_v34  ;;  %v734_v40 = vpop.f32.mrf.mxu1 }
 0x3ab   :  { %v779_v42 = vpack.c.bf16 %v777_v37, %v777_v37  ;;  %v774_v43 = vpop.f32.mrf.mxu0  ;;  %v778_v61 = vmax.f32 %v733_v59, 0.0 }
 0x3ac   :  { %v1128_v44 = vmax.f32 %v1127_v39, 0.0  ;;  %v735_v45 = vpop.f32.mrf.mxu1 }
 0x3ad   :  { %v1397_v46 = vpop.f32.mrf.mxu0  ;;  %1415 = vmatmul.mubr.bf16.vlgmr.msra.gmra.mxu1 %v779_v42  ;;  %v1005_v63 = vpack.c.bf16 %v778_v61, %v778_v61 }
 0x3ae   :  { %v1129_v47 = vadd.f32 1.0, %v1128_v44  ;;  %1439 = vmatpush3.bf16.msra.mxu1 %v1540_v41  ;;  %1454 = vmatprep.mubr.msk.bf16.mxu1 %vm1812_vm0, %v1811_v0 }
 0x3af   :  { %1440 = vmatprep.subr.bf16.mxu1 %v1811_v0 }
 0x3b0   :  { %1556 = vrcp.f32 %v1129_v47 }
 0x3b2   :  { %1441 = vmatpush3.bf16.msra.mxu1 %v1541_v48 }
 0x3b3   :  { %1442 = vmatprep.subr.bf16.mxu1 %v1811_v0 }
 0x3b6   :  { %1443 = vmatpush3.bf16.msra.mxu1 %v1542_v49 }
 0x3b7   :  { %1444 = vmatprep.subr.bf16.mxu1 %v1811_v0 }
 0x3ba   :  { %1445 = vmatpush3.bf16.msra.mxu1 %v1543_v50 }
 0x3bb   :  { %1446 = vmatprep.subr.bf16.mxu1 %v1811_v0 }
 0x3bd   :  { %v1557_v54 = vpop.eup %1556 }
 0x3be   :  { %1447 = vmatpush3.bf16.msra.mxu1 %v1544_v52  ;;  %v2026_v55 = vsel %vm1134_vm1, %v1557_v54, 0.0 }
 0x3bf   :  { %1136 = vadd.xlane.f32.xlu0 %v2026_v55  ;;  %1448 = vmatprep.subr.bf16.mxu1 %v1811_v0 }
 0x3c2   :  { %1449 = vmatpush3.bf16.msra.mxu1 %v1545_v56 }
 0x3c3   :  { %1450 = vmatprep.subr.bf16.mxu1 %v1811_v0 }
 0x3c6   :  { %1451 = vmatpush3.bf16.msra.mxu1 %v1546_v58 }
 0x3c7   :  { %1452 = vmatprep.subr.bf16.mxu1 %v1811_v0 }
 0x3ca   :  { %1453 = vmatpush3.bf16.msra.mxu1 %v1547_v60 }
 0x3cd   :  { %1455 = vmatmul.mubr.bf16.vlgmr.msra.gmra.mxu1 %v1005_v63 }
 0x448   :  { %v1137_v23 = vpop.xlane.xlu0 %1136 }
 0x46d   :  { %v885_v9 = vpop.f32.mrf.mxu1 }
 0x46e   :  { %v886_v10 = vadd.f32 %v1227_v8, %v885_v9 }
 0x46f   :  { %v1416_v11 = vpop.f32.mrf.mxu1 }
 0x470   :  { %v891_v12 = vmax.f32 %v886_v10, 0.0 }
 0x471   :  { %v888_v13 = vpop.f32.mrf.mxu1 }
 0x472   :  { %v892_v14 = vpack.c.bf16 %v891_v12, %v891_v12 }
 0x473   :  { %v1417_v15 = vpop.f32.mrf.mxu1 }
 0x474   :  { %1435 = vmatmul.mubr.bf16.vlgmr.msra.gmra.mxu0 %v892_v14 }
 0x48d   :  { %v1111_v17 = vpop.f32.mrf.mxu1 }
 0x48e   :  { %v1112_v0 = vadd.f32 %v1245_v16, %v1111_v17 }
 0x48f   :  { %v1456_v18 = vpop.f32.mrf.mxu1 }
 0x490   :  { %v1117_v19 = vmax.f32 %v1112_v0, 0.0 }
 0x491   :  { %v1114_v20 = vpop.f32.mrf.mxu1 }
 0x492   :  { %v1254_v21 = vmul.f32 -1.442695, %v1117_v19 }
 0x493   :  { %v1457_v22 = vpop.f32.mrf.mxu1 }
 0x494   :  { %1558 = vpow2.f32 %v1254_v21 }
 0x495   :  { %1560 = vrcp.f32 %v1137_v23 }
 0x4a1   :  { %v1559_v24 = vpop.eup %1558 }
 0x4a2   :  { %v1121_v25 = vadd.f32 1.0, %v1559_v24  ;;  %v1561_v26 = vpop.eup %1560 }
 0x4a3   :  { %v1139_v27 = vmul.f32 %v1561_v26, %v2026_v55 }
 0x4a4   :  { %1562 = vrcp.f32 %v1121_v25 }
 0x4b1   :  { %v1563_v28 = vpop.eup %1562 }
 0x4b2   :  { %v1141_v29 = vsel %vm1140_vm2, %v1563_v28, %v1139_v27 }
 0x4b3   :  { %1142 = vst [vmem:[#allocation18] sm:$0xff] %v1141_v29 }
 0x4b4   :  { %1755 = shalt.err (!%p1752_p7)
}
 0x4b5   :  { %1162 = dma.vmem_to_hbm [thread:$0]  %s1160_s15, 128, %s2073_s17, [#allocation19]   ;;  %v1236_v30 = vld [vmem:[%s2069_s13] ss:$0 sm:$0xff] }
 0x4b6   :  { %s1815_s22 = smov [#allocation17]  }
 0x4b7   :  { %s1149_s8 = sshll.u32 %s1815_s22, 4  ;;  %s1150_s8 = int_to_ptr.vmem [resolvable:$true] %s1149_s8 }
 0x4b8   :  { %s1764_s2 = scalar_lea.vmem %s1150_s8, 128  ;;  %p1769_p9 = scmp.lt.s32.totalorder %s1150_s8, %s1150_s8 }
 0x4b9   :  { %p1765_p8 = scmp.ne.s32.totalorder %s1150_s8, %s1764_s2  ;;  %p1770_p10 = scmp.lt.s32.totalorder %s1764_s2, %s1764_s2 }
 0x4bb   :  { %p1771_p11 = por %p1770_p10, %p1769_p9 }
 0x4bd   :  { %p1772_p12 = pnand %p1771_p11, %p1765_p8 }
 0x534   :  { %v998_v31 = vpop.f32.mrf.mxu0 }
 0x535   :  { %v999_v32 = vadd.f32 %v1236_v30, %v998_v31 }
 0x536   :  { %v1436_v33 = vpop.f32.mrf.mxu0 }
 0x537   :  { %1004 = vst [vmem:[#allocation17] sm:$0xff] %v999_v32 }
 0x538   :  { %v1001_v34 = vpop.f32.mrf.mxu0 }
 0x539   :  { %1775 = shalt.err (!%p1772_p12)
}
 0x53a   :  { %1152 = dma.vmem_to_hbm [thread:$0]  %s1150_s8, 128, %s2072_s16, [#allocation4]   ;;  %v1437_v35 = vpop.f32.mrf.mxu0 }
 0x53b   :  { %1794 = dma.done.wait [#allocation4], 128  }
 0x53c   :  { %1795 = vsyncadd [#allocation4], 4294967168 }
 0x53d   :  { %1796 = dma.done.wait [#allocation19], 128  }
 0x53e   :  { %1797 = vsyncadd [#allocation19], 4294967168 }
 0x53f   :  { %1169 = vsyncpa [#allocation3], 1 }
 0x540   :  { %1170 = vsyncpa [#allocation6], 1 }
 0x541   :  { %1171 = vsyncpa [#allocation9], 1 }
 0x542   :  { %1172 = vsyncpa [#allocation12], 1 }
 0x543   :  { %1173 = vsyncpa [#allocation15], 1 }
 0x544   :  { %1174 = vsyncpa [#allocation4], 1 }
 0x545   :  { %1175 = vsyncpa [#allocation19], 1 }

</bundles_post_ra>
